<compile_context>
chip_gen: v6e
topology: v6e:2x2x1
jax: 0.10.0
libtpu: 0.0.40
codegen_flags: <defaults>
</compile_context>

<pallas_src>
import functools

import jax
import jax.numpy as jnp
from jax.experimental import pallas as pl
from jax.experimental.pallas import tpu as pltpu

_EPS = 1e-5
_NEG_SLOPE = 0.01  # PyTorch LeakyReLU default


def _conv_subpixel_kernel(xp_ref, w_ref, out_ref, stats_ref):
    """Fused {nearest-2x upsample + 3x3 conv} for one row block + BN partial sums.

    xp_ref    : (1, H+2, W+2, Cin)  1-padded ORIGINAL-resolution image (bf16), full image
    w_ref     : (9*Cin, 4*Cout)     parity-merged subpixel weights (bf16), K rows = (dy, dx, c)
    out_ref   : (1, TH*W, 4*Cout)   conv rows for this row block (bf16);
                                    row = t*W + j (global i = r*TH + t), lane = (2a+b)*Cout + o
    stats_ref : (1, 1, 2, 4*Cout)   f32 [sum, sum-of-squares] partials for BatchNorm
    """
    _, Hp, Wp, Cin = xp_ref.shape
    W = Wp - 2
    TH = out_ref.shape[1] // W

    r0 = pl.multiple_of(pl.program_id(1) * TH, TH)

    # 9-tap im2col patch of the padded original-resolution input, built ONCE and consumed by a
    # single K = 9*Cin matmul (the merged weight matrix holds zeros for the taps a parity skips).
    taps = [xp_ref[0, pl.ds(r0 + dy, TH), dx:dx + W, :]
            for dy in range(3) for dx in range(3)]
    patch = jnp.concatenate(taps, axis=-1).reshape(TH * W, 9 * Cin)

    acc = jnp.dot(patch, w_ref[...], preferred_element_type=jnp.float32)   # (TH*W, 4*Cout) f32

    out_ref[0] = acc.astype(out_ref.dtype)
    stats_ref[0, 0] = jnp.concatenate(
        [jnp.sum(acc, axis=0, keepdims=True),
         jnp.sum(acc * acc, axis=0, keepdims=True)], axis=0)               # (2, 4*Cout)


def _build_subpixel_weights(weight_oihw):
    """OIHW 3x3 conv weights -> (9*Cin, 4*Cout) matrix folding the nearest-2x upsample.

    Output pixel (2i+a, 2j+b) only reads original-resolution rows i-1..i+1 / cols j-1..j+1; each
    conv tap ky (kx) collapses onto one of those offsets for a given parity, giving a per-parity
    (3,3,Cin,Cout) weight tensor that is zero outside a 2x2 window.  The 4 parities are stacked
    along the output (lane) axis in order (2a+b).
    """
    w = jnp.transpose(weight_oihw, (2, 3, 1, 0)).astype(jnp.float32)       # (3,3,Cin,Cout) HWIO
    Cin, Cout = w.shape[2], w.shape[3]
    fold = (jnp.array([[1., 0., 0.], [0., 1., 0.], [0., 1., 0.]], jnp.float32),  # row/col parity 0
            jnp.array([[0., 1., 0.], [0., 1., 0.], [0., 0., 1.]], jnp.float32))  # row/col parity 1
    blocks = []
    for a in range(2):
        for b in range(2):
            w_sub = jnp.einsum('yY,xX,yxco->YXco', fold[a], fold[b], w)    # (3,3,Cin,Cout)
            blocks.append(w_sub.reshape(9 * Cin, Cout))                    # K rows = (dy, dx, c)
    return jnp.concatenate(blocks, axis=-1)                                # (9*Cin, 4*Cout)


def _auto_row_block(H, W, Cin, Cout, budget_bytes=8 << 20):
    """Largest divisor of H whose in-kernel live set (patch + acc + output rows) fits the budget."""
    per_row = W * (9 * max(Cin, 128) * 2 + max(4 * Cout, 128) * 6)
    th = max(1, min(H, budget_bytes // max(per_row, 1)))
    while H % th:
        th -= 1
    return th


def up_conv_forward(x_nchw, weight_oihw, bias, gamma, beta, *, row_block=None):
    """NCHW in / NCHW out, matching the PyTorch `up_conv` module (training-mode BatchNorm).

    `bias` is accepted for signature parity but unused: training-mode BatchNorm removes any
    per-channel constant added before it, so the output is mathematically identical.
    """
    del bias
    N, Cin, H, W = x_nchw.shape
    Cout = weight_oihw.shape[0]
    H2, W2 = 2 * H, 2 * W
    HW = H * W
    C4 = 4 * Cout

    if row_block is None:
        row_block = _auto_row_block(H, W, Cin, Cout)
    assert H % row_block == 0, (H, row_block)
    TH = row_block
    R = H // TH

    # --- glue: NCHW -> NHWC + 1-pixel zero pad at ORIGINAL resolution, bf16 activations --------
    x = jnp.transpose(x_nchw, (0, 2, 3, 1))
    xp = jnp.pad(x, ((0, 0), (1, 1), (1, 1), (0, 0))).astype(jnp.bfloat16)  # (N, H+2, W+2, Cin)
    w9 = _build_subpixel_weights(weight_oihw).astype(jnp.bfloat16)          # (9*Cin, 4*Cout)

    # --- pass 1: subpixel conv + BN partials; grid = (batch, row blocks), both "parallel" ------
    # TODO(synk): for images too large to keep the padded original-resolution input resident in
    # VMEM, switch the input to memory_space=pl.ANY + manual halo DMA per row block.
    in_bytes = (H + 2) * (W + 2) * max(Cin, 128) * 2            # lane-padded bf16 image
    out_bytes = TH * W * max(C4, 128) * 2
    tmp_bytes = TH * W * (9 * max(Cin, 128) * 2 + max(C4, 128) * 4)
    need = 2 * in_bytes + 2 * out_bytes + tmp_bytes + (4 << 20)
    params = pltpu.CompilerParams(
        dimension_semantics=("parallel", "parallel"),
        vmem_limit_bytes=int(min(max(need, 32 << 20), 48 << 20)))
    cost = pl.CostEstimate(
        flops=2 * N * HW * 9 * Cin * C4,
        transcendentals=0,
        bytes_accessed=xp.size * 2 + w9.size * 2 + N * HW * C4 * 2 + N * R * 2 * C4 * 4)

    conv_out, stats = pl.pallas_call(
        _conv_subpixel_kernel,
        out_shape=(jax.ShapeDtypeStruct((N, HW, C4), jnp.bfloat16),
                   jax.ShapeDtypeStruct((N, R, 2, C4), jnp.float32)),
        grid=(N, R),
        in_specs=[pl.BlockSpec((1, H + 2, W + 2, Cin), lambda n, r: (n, 0, 0, 0)),
                  pl.BlockSpec((9 * Cin, C4), lambda n, r: (0, 0))],
        out_specs=(pl.BlockSpec((1, TH * W, C4), lambda n, r: (n, r, 0)),
                   pl.BlockSpec((1, 1, 2, C4), lambda n, r: (n, r, 0, 0))),
        compiler_params=params,
        cost_estimate=cost,
    )(xp, w9)

    # --- global BatchNorm statistics: tiny (Cout,)-sized wrapper math ---------------------------
    count = float(N * H2 * W2)
    tot = jnp.sum(stats, axis=(0, 1)).reshape(2, 4, Cout).sum(axis=1)        # (2, Cout)
    mean = tot[0] / count
    var = jnp.maximum(tot[1] / count - mean * mean, 0.0)                     # biased (train-mode)
    scale = gamma.astype(jnp.float32) * jax.lax.rsqrt(var + _EPS)
    shift = beta.astype(jnp.float32) - mean * scale

    # --- BN apply + LeakyReLU fused by XLA into the parity de-interleave / NCHW transpose ------
    y = conv_out.astype(jnp.float32).reshape(N, H, W, 2, 2, Cout) * scale + shift
    y = jnp.where(y >= 0, y, _NEG_SLOPE * y)
    y = jnp.transpose(y, (0, 5, 1, 3, 2, 4))                                 # (n, o, i, a, j, b)
    return y.reshape(N, Cout, H2, W2)                                        # out[n,o,2i+a,2j+b]


def ref_forward(x_nchw, weight_oihw, bias, gamma, beta):
    """Pure-JAX reference of the PyTorch forward (training-mode BatchNorm)."""
    x = jnp.repeat(jnp.repeat(x_nchw, 2, axis=2), 2, axis=3)
    y = jax.lax.conv_general_dilated(
        x, weight_oihw, window_strides=(1, 1), padding=((1, 1), (1, 1)),
        dimension_numbers=("NCHW", "OIHW", "NCHW"),
        precision=jax.lax.Precision.HIGHEST)
    y = y + bias[None, :, None, None]
    mean = jnp.mean(y, axis=(0, 2, 3), keepdims=True)
    var = jnp.mean((y - mean) ** 2, axis=(0, 2, 3), keepdims=True)
    y = (y - mean) * jax.lax.rsqrt(var + _EPS)
    y = y * gamma[None, :, None, None] + beta[None, :, None, None]
    return jnp.where(y >= 0, y, _NEG_SLOPE * y)


if __name__ == "__main__":
    # small shapes consistent with the module: N=2, ch_in=4, ch_out=8, 16x16 spatial
    N, CH_IN, CH_OUT, H, W = 2, 4, 8, 16, 16

    key = jax.random.PRNGKey(0)
    kx, kw, kb, kg, kbt = jax.random.split(key, 5)
    x = jax.random.normal(kx, (N, CH_IN, H, W), dtype=jnp.float32)
    weight = 0.1 * jax.random.normal(kw, (CH_OUT, CH_IN, 3, 3), dtype=jnp.float32)
    bias = 0.1 * jax.random.normal(kb, (CH_OUT,), dtype=jnp.float32)
    gamma = 1.0 + 0.1 * jax.random.normal(kg, (CH_OUT,), dtype=jnp.float32)
    beta = 0.1 * jax.random.normal(kbt, (CH_OUT,), dtype=jnp.float32)

    # row_block=8 -> 2 row blocks per image, exercising the halo/row-tiling path.
    fwd = jax.jit(functools.partial(up_conv_forward, row_block=8))
    out = jax.block_until_ready(fwd(x, weight, bias, gamma, beta))

    ref = ref_forward(x, weight, bias, gamma, beta)
    assert out.shape == (N, CH_OUT, 2 * H, 2 * W), out.shape
    max_err = float(jnp.max(jnp.abs(out - ref)))
    # bf16 single-pass MXU matmul + bf16 HBM intermediate (per the perf review) give ~2^-8
    # relative error on pre-normalization values; 2e-2 abs/rel covers that with margin.
    assert jnp.allclose(out, ref, atol=2e-2, rtol=2e-2), max_err

    print("KERNEL_OK")
</pallas_src>

<mosaic_0001>
module attributes {stable_mosaic.version = 11 : i64} {
  func.func @_conv_subpixel_kernel(%arg0: i32, %arg1: i32, %arg2: memref<1x18x18x4xbf16, #tpu.memory_space<vmem>>, %arg3: memref<36x32xbf16, #tpu.memory_space<vmem>>, %arg4: memref<1x128x32xbf16, #tpu.memory_space<vmem>>, %arg5: memref<1x1x2x32xf32, #tpu.memory_space<vmem>>) attributes {dimension_semantics = [#tpu.dimension_semantics<parallel>, #tpu.dimension_semantics<parallel>], iteration_bounds = array<i64: 2, 2>, scalar_prefetch = 0 : i64, scratch_operands = 0 : i64, tpu.core_type = #tpu.core_type<tc>, window_params = [{transform_indices = @transform_0, window_bounds = array<i64: 1, 18, 18, 4>}, {pipeline_mode = #tpu.pipeline_mode<synchronous>, transform_indices = @transform_1, window_bounds = array<i64: 36, 32>}, {transform_indices = @transform_2, window_bounds = array<i64: 1, 128, 32>}, {transform_indices = @transform_3, window_bounds = array<i64: 1, 1, 2, 32>}]} {
    %c8_i32 = arith.constant 8 : i32
    %0 = arith.muli %arg1, %c8_i32 : i32
    %1 = tpu.assume_multiple %0, 8 : i32
    %c0_i32 = arith.constant 0 : i32
    %2 = arith.addi %1, %c0_i32 : i32
    %c0 = arith.constant 0 : index
    %3 = arith.index_cast %2 : i32 to index
    %c0_0 = arith.constant 0 : index
    %c0_1 = arith.constant 0 : index
    %4 = vector.load %arg2[%c0, %3, %c0_0, %c0_1] : memref<1x18x18x4xbf16, #tpu.memory_space<vmem>>, vector<1x8x16x4xbf16>
    %5 = vector.shape_cast %4 : vector<1x8x16x4xbf16> to vector<8x16x4xbf16>
    %c0_i32_2 = arith.constant 0 : i32
    %6 = arith.addi %1, %c0_i32_2 : i32
    %c0_3 = arith.constant 0 : index
    %7 = arith.index_cast %6 : i32 to index
    %c1 = arith.constant 1 : index
    %c0_4 = arith.constant 0 : index
    %8 = vector.load %arg2[%c0_3, %7, %c1, %c0_4] : memref<1x18x18x4xbf16, #tpu.memory_space<vmem>>, vector<1x8x16x4xbf16>
    %9 = vector.shape_cast %8 : vector<1x8x16x4xbf16> to vector<8x16x4xbf16>
    %c0_i32_5 = arith.constant 0 : i32
    %10 = arith.addi %1, %c0_i32_5 : i32
    %c0_6 = arith.constant 0 : index
    %11 = arith.index_cast %10 : i32 to index
    %c2 = arith.constant 2 : index
    %c0_7 = arith.constant 0 : index
    %12 = vector.load %arg2[%c0_6, %11, %c2, %c0_7] : memref<1x18x18x4xbf16, #tpu.memory_space<vmem>>, vector<1x8x16x4xbf16>
    %13 = vector.shape_cast %12 : vector<1x8x16x4xbf16> to vector<8x16x4xbf16>
    %c1_i32 = arith.constant 1 : i32
    %14 = arith.addi %1, %c1_i32 : i32
    %c0_8 = arith.constant 0 : index
    %15 = arith.index_cast %14 : i32 to index
    %c0_9 = arith.constant 0 : index
    %c0_10 = arith.constant 0 : index
    %16 = vector.load %arg2[%c0_8, %15, %c0_9, %c0_10] : memref<1x18x18x4xbf16, #tpu.memory_space<vmem>>, vector<1x8x16x4xbf16>
    %17 = vector.shape_cast %16 : vector<1x8x16x4xbf16> to vector<8x16x4xbf16>
    %c1_i32_11 = arith.constant 1 : i32
    %18 = arith.addi %1, %c1_i32_11 : i32
    %c0_12 = arith.constant 0 : index
    %19 = arith.index_cast %18 : i32 to index
    %c1_13 = arith.constant 1 : index
    %c0_14 = arith.constant 0 : index
    %20 = vector.load %arg2[%c0_12, %19, %c1_13, %c0_14] : memref<1x18x18x4xbf16, #tpu.memory_space<vmem>>, vector<1x8x16x4xbf16>
    %21 = vector.shape_cast %20 : vector<1x8x16x4xbf16> to vector<8x16x4xbf16>
    %c1_i32_15 = arith.constant 1 : i32
    %22 = arith.addi %1, %c1_i32_15 : i32
    %c0_16 = arith.constant 0 : index
    %23 = arith.index_cast %22 : i32 to index
    %c2_17 = arith.constant 2 : index
    %c0_18 = arith.constant 0 : index
    %24 = vector.load %arg2[%c0_16, %23, %c2_17, %c0_18] : memref<1x18x18x4xbf16, #tpu.memory_space<vmem>>, vector<1x8x16x4xbf16>
    %25 = vector.shape_cast %24 : vector<1x8x16x4xbf16> to vector<8x16x4xbf16>
    %c2_i32 = arith.constant 2 : i32
    %26 = arith.addi %1, %c2_i32 : i32
    %c0_19 = arith.constant 0 : index
    %27 = arith.index_cast %26 : i32 to index
    %c0_20 = arith.constant 0 : index
    %c0_21 = arith.constant 0 : index
    %28 = vector.load %arg2[%c0_19, %27, %c0_20, %c0_21] : memref<1x18x18x4xbf16, #tpu.memory_space<vmem>>, vector<1x8x16x4xbf16>
    %29 = vector.shape_cast %28 : vector<1x8x16x4xbf16> to vector<8x16x4xbf16>
    %c2_i32_22 = arith.constant 2 : i32
    %30 = arith.addi %1, %c2_i32_22 : i32
    %c0_23 = arith.constant 0 : index
    %31 = arith.index_cast %30 : i32 to index
    %c1_24 = arith.constant 1 : index
    %c0_25 = arith.constant 0 : index
    %32 = vector.load %arg2[%c0_23, %31, %c1_24, %c0_25] : memref<1x18x18x4xbf16, #tpu.memory_space<vmem>>, vector<1x8x16x4xbf16>
    %33 = vector.shape_cast %32 : vector<1x8x16x4xbf16> to vector<8x16x4xbf16>
    %c2_i32_26 = arith.constant 2 : i32
    %34 = arith.addi %1, %c2_i32_26 : i32
    %c0_27 = arith.constant 0 : index
    %35 = arith.index_cast %34 : i32 to index
    %c2_28 = arith.constant 2 : index
    %c0_29 = arith.constant 0 : index
    %36 = vector.load %arg2[%c0_27, %35, %c2_28, %c0_29] : memref<1x18x18x4xbf16, #tpu.memory_space<vmem>>, vector<1x8x16x4xbf16>
    %37 = vector.shape_cast %36 : vector<1x8x16x4xbf16> to vector<8x16x4xbf16>
    %38 = tpu.concatenate %5, %9, %13, %17, %21, %25, %29, %33, %37 in 2 : vector<8x16x4xbf16>, vector<8x16x4xbf16>, vector<8x16x4xbf16>, vector<8x16x4xbf16>, vector<8x16x4xbf16>, vector<8x16x4xbf16>, vector<8x16x4xbf16>, vector<8x16x4xbf16>, vector<8x16x4xbf16> -> vector<8x16x36xbf16>
    %39 = vector.shape_cast %38 : vector<8x16x36xbf16> to vector<128x36xbf16>
    %c0_30 = arith.constant 0 : index
    %c0_31 = arith.constant 0 : index
    %40 = vector.load %arg3[%c0_30, %c0_31] : memref<36x32xbf16, #tpu.memory_space<vmem>>, vector<36x32xbf16>
    %cst = arith.constant dense<0.000000e+00> : vector<128x32xf32>
    %41 = tpu.matmul %39, %40, %cst {dimension_numbers = #tpu.dot_dimension_numbers<[1], [0], [0], [1], [0, 0, 1, 1], [], []>} : vector<128x36xbf16>, vector<36x32xbf16>, vector<128x32xf32> -> vector<128x32xf32>
    %42 = arith.truncf %41 : vector<128x32xf32> to vector<128x32xbf16>
    %c0_32 = arith.constant 0 : index
    %c0_33 = arith.constant 0 : index
    %c0_34 = arith.constant 0 : index
    %43 = vector.load %arg4[%c0_32, %c0_33, %c0_34] : memref<1x128x32xbf16, #tpu.memory_space<vmem>>, vector<1x128x32xbf16>
    %44 = vector.shape_cast %43 : vector<1x128x32xbf16> to vector<128x32xbf16>
    %45 = vector.shape_cast %42 : vector<128x32xbf16> to vector<1x128x32xbf16>
    tpu.vector_store %arg4[%c0_32, %c0_33, %c0_34], %45 {strides = array<i32>} : memref<1x128x32xbf16, #tpu.memory_space<vmem>>, vector<1x128x32xbf16>,
    %cst_35 = arith.constant dense<0.000000e+00> : vector<32xf32>
    %46 = vector.multi_reduction <add>, %41, %cst_35 [0] : vector<128x32xf32> to vector<32xf32>
    %47 = vector.shape_cast %46 : vector<32xf32> to vector<1x32xf32>
    %48 = arith.mulf %41, %41 : vector<128x32xf32>
    %cst_36 = arith.constant dense<0.000000e+00> : vector<32xf32>
    %49 = vector.multi_reduction <add>, %48, %cst_36 [0] : vector<128x32xf32> to vector<32xf32>
    %50 = vector.shape_cast %49 : vector<32xf32> to vector<1x32xf32>
    %51 = tpu.concatenate %47, %50 in 0 : vector<1x32xf32>, vector<1x32xf32> -> vector<2x32xf32>
    %c0_37 = arith.constant 0 : index
    %c0_38 = arith.constant 0 : index
    %c0_39 = arith.constant 0 : index
    %c0_40 = arith.constant 0 : index
    %52 = vector.load %arg5[%c0_37, %c0_38, %c0_39, %c0_40] : memref<1x1x2x32xf32, #tpu.memory_space<vmem>>, vector<1x1x2x32xf32>
    %53 = vector.shape_cast %52 : vector<1x1x2x32xf32> to vector<2x32xf32>
    %54 = vector.shape_cast %51 : vector<2x32xf32> to vector<1x1x2x32xf32>
    tpu.vector_store %arg5[%c0_37, %c0_38, %c0_39, %c0_40], %54 {strides = array<i32>} : memref<1x1x2x32xf32, #tpu.memory_space<vmem>>, vector<1x1x2x32xf32>,
    return
  }
  func.func @transform_0(%arg0: i32, %arg1: i32) -> (i32, i32, i32, i32) {
    %c0_i32 = arith.constant 0 : i32
    %c0_i32_0 = arith.constant 0 : i32
    %c0_i32_1 = arith.constant 0 : i32
    %c0_i32_2 = arith.constant 0 : i32
    return %arg0, %c0_i32, %c0_i32_0, %c0_i32_1 : i32, i32, i32, i32
  }
  func.func @transform_1(%arg0: i32, %arg1: i32) -> (i32, i32) {
    %c0_i32 = arith.constant 0 : i32
    %c0_i32_0 = arith.constant 0 : i32
    %c0_i32_1 = arith.constant 0 : i32
    return %c0_i32, %c0_i32_0 : i32, i32
  }
  func.func @transform_2(%arg0: i32, %arg1: i32) -> (i32, i32, i32) {
    %c0_i32 = arith.constant 0 : i32
    %c0_i32_0 = arith.constant 0 : i32
    return %arg0, %arg1, %c0_i32 : i32, i32, i32
  }
  func.func @transform_3(%arg0: i32, %arg1: i32) -> (i32, i32, i32, i32) {
    %c0_i32 = arith.constant 0 : i32
    %c0_i32_0 = arith.constant 0 : i32
    %c0_i32_1 = arith.constant 0 : i32
    return %arg0, %arg1, %c0_i32, %c0_i32_0 : i32, i32, i32, i32
  }
}

</mosaic_0001>

<bundles_post_ra>
// kernel: up_conv_forward.1
= control target key start
LH: loop header
LB: loop body
LE: loop exit
PB: predicated region body
PF: predicated region fallthrough
CT: control target
= control target key end

     0   :  { %s2101_s12 = smov 0   ;;  %s2103_s13 = smov 0   ;;  %s2659_s0 = inlined_call_operand.vmem [shape: bf16[2,18,18,4], index: 0, kind: input, shape index: {}]   ;;  %s2660_s1 = inlined_call_operand.vmem [shape: bf16[36,32], index: 1, kind: input, shape index: {}]   ;;  %s2661_s2 = inlined_call_operand.vmem [shape: bf16[2,256,32], index: 2, kind: output, shape index: {0}]   ;;  %s2662_s3 = inlined_call_operand.vmem [shape: f32[2,2,2,32], index: 3, kind: output, shape index: {1}]  }
   0x1   :  { %s2105_s14 = smov 0   ;;  %s2107_s15 = smov 0  }
   0x2   :  { %s2109_s16 = smov 0  }
   0x3 LB: > { %s23_s17 = sadd.s32 1, %s2063_s14  ;;  %s26_s18 = sadd.s32 1, %s2067_s15  ;;  %s2071_s16 = sphi %s2109_s16, %s14_s16   ;;  %s2067_s15 = sphi %s2107_s15, %s2666_s15   ;;  %s2063_s14 = sphi %s2105_s14, %s2665_s14   ;;  %s2059_s13 = sphi %s2103_s13, %s2664_s13   ;;  %s2055_s12 = sphi %s2101_s12, %s2663_s12  }
   0x4   : > { %p24_p0 = scmp.ge.s32.totalorder %s23_s17, 2  ;;  %p1672_p1 = scmp.ge.s32.totalorder %s2071_s16, 1 }
   0x5   : > { %p156_p2 = scmp.lt.s32.totalorder %s2071_s16, 5 }
   0x6   : > { %s2668_s17 = smov (%p24_p0, %s23_s17), 0  ;;  %s2670_s18 = smov (!%p24_p0, %s26_s18), %s2067_s15 }
   0x7   : > { %p157_p3 = pnand %p1672_p1, %p156_p2  ;;  %p28_p4 = scmp.ge.s32.totalorder %s2670_s18, 2 }
   0x8   : > { %p192_p5 = scmp.lt.s32.totalorder (!%p157_p3), %s2059_s13, 1  ;;  %s1851_s19 = smul.u32 (!%p157_p3), 96, %s2055_s12 }
   0x9   : > { %s2672_s18 = smov (%p28_p4, %s2670_s18), 0  ;;  %160 = sbr.rel (%p157_p3) target bundleno = 489 (0x1e9), region = 28 }
   0xa   : > { %s2073_s25 = smov (!%p157_p3), 12   ;;  %s2074_s26 = smov (!%p157_p3), 20  }
   0xb   : > { %s2075_s27 = smov (!%p157_p3), 8   ;;  %s2076_s28 = smov (!%p157_p3), 4  }
   0xc   : > { %s2077_s29 = smov (!%p157_p3), 16   ;;  %s2078_s30 = smov (!%p157_p3), 24  }
   0xd   : > { %s2079_s4 = smov (!%p157_p3), 28   ;;  %s2080_s5 = smov (!%p157_p3), 32  }
   0xe   : > { %s2674_s13 = smov (!%p192_p5, %s2059_s13), 1  ;;  %vm525_vm0 = vcmask 1046528   ;;  %vm388_vm1 = vsmask.f32 7424  ;;  %vm1251_vm2 = vcmask 1041408   ;;  %vm1078_vm3 = vcmask 31744  }
   0xf   : > { %s1909_s20 = smul.u32 216, %s2674_s13  ;;  %vm1095_vm4 = vcmask 64512   ;;  %vm1112_vm5 = vcmask 97280   ;;  %vm1129_vm6 = vcmask 130048   ;;  %vm1146_vm7 = vcmask 162816   ;;  %p209_p7 = scmp.lt.s32.totalorder %s2055_s12, 1 }
  0x10   : > { %vm1163_vm8 = vcmask 195584   ;;  %vm1180_vm9 = vcmask 228352   ;;  %vm1197_vm10 = vcmask 261120   ;;  %vm1234_vm11 = vcmask 293888  }
  0x11   : > { %s196_s23 = scalar_lea.vmem %s2659_s0, %s1909_s20  ;;  %s1675_s20 = sshll.u32 %s2674_s13, 5  ;;  %vm1416_vm12 = vcmask 257024   ;;  %vm1523_vm13 = vcmask 1040384   ;;  %vm1525_vm14 = vcmask 254976  }
  0x12   : > { %s2140_s24 = scalar_lea.vmem %s196_s23, %s1851_s19  ;;  %s1674_s19 = sshll.u32 %s2055_s12, 4 }
  0x13   : > { %v1686_v0 = vld [vmem:[%s2140_s24 + $0x18] sm:$0xf]  ;;  %v1687_v1 = vld [vmem:[%s2140_s24 + $0x1c] sm:$0xf]  ;;  %v1684_v5 = vld [vmem:[%s2140_s24 + $0xc] sm:$0xf] }
  0x14   : > { %v1709_v2 = vld [vmem:[%s2140_s24 + $0x18] sm:$0xe]  ;;  %v2145_v3 = vcombine.low %v1686_v0, %v1687_v1  ;;  %v1685_v6 = vld [vmem:[%s2140_s24 + $0x10] sm:$0xf]  ;;  %v1708_v7 = vld [vmem:[%s2140_s24 + $0xc] sm:$0xe] }
  0x15   : > { %v1791_v4 = vcombine.low %v1709_v2, %v1687_v1  ;;  %v2150_v8 = vcombine.low %v1684_v5, %v1685_v6  ;;  %v1790_v9 = vcombine.low %v1708_v7, %v1685_v6  ;;  %v2153_v10 = vld [vmem:[%s2140_s24 + $0x14] ss:$0 sps:$4 sm:$0x11]   ;;  %v221_v12 = vld [vmem:[%s2140_s24 + $0x4] sm:$0xf]  ;;  %p200_p6 = scmp.lt.s32.totalorder %s1674_s19, 31 }
  0x16   : > { %608 = vrot.lane.b32.xlu1 %v2145_v3, %s2073_s25  ;;  %v661_v11 = vshll.u32 %v2145_v3, 16  ;;  %v783_v15 = vrot.slane %v2153_v10, 1  ;;  %v244_v16 = vld [vmem:[%s2140_s24] sm:$0xe]  ;;  %v659_v21 = vshrl.u32 %v2145_v3, 16  ;;  %v654_v59 = vshll.u32 %v2153_v10, 16 }
  0x17   : > { %606 = vrot.lane.b32.xlu0 %v2150_v8, %s2073_s25  ;;  %v649_v13 = vshll.u32 %v2150_v8, 16  ;;  %v782_v14 = vrot.slane %v1790_v9, 1  ;;  %v785_v17 = vrot.slane %v1791_v4, 1  ;;  %v1963_v18 = vld [vmem:[%s2140_s24 + $0x8] ss:$0 sps:$4 sm:$0x11]   ;;  %v1766_v19 = vcombine.low %v244_v16, %v221_v12 }
  0x18   : > { %v220_v20 = vld [vmem:[%s2140_s24] sm:$0xf]  ;;  %v222_v24 = vld [vmem:[%s2140_s24 + $0xc] sm:$0xf]  ;;  %v223_v25 = vld [vmem:[%s2140_s24 + $0x10] sm:$0xf] }
  0x19   : > { %v784_v22 = vsel %vm525_vm0, %v782_v14, %v783_v15  ;;  %v2168_v23 = vcombine.low %v220_v20, %v221_v12  ;;  %v526_v26 = vrot.slane %v1766_v19, 1  ;;  %v527_v27 = vrot.slane %v1963_v18, 1  ;;  %v245_v28 = vld [vmem:[%s2140_s24 + $0xc] sm:$0xe]  ;;  %v1720_v43 = vld [vmem:[%s2140_s24 + $0x24] sm:$0xf] }
  0x1a   : > { %v2173_v29 = vcombine.low %v222_v24, %v223_v25  ;;  %v397_v30 = vshll.u32 %v1963_v18, 16  ;;  %v1967_v31 = vld [vmem:[%s2140_s24 + $0x14] ss:$0 sps:$4 sm:$0x11]   ;;  %v1767_v32 = vcombine.low %v245_v28, %v223_v25  ;;  %v663_v35 = vrot.slane %v661_v11, 1  ;;  %s2676_s19 = smov (!%p200_p6, %s1674_s19), 31 }
  0x1b   : > { %806 = vrot.lane.b32.xlu0 %v784_v22, %s2074_s26  ;;  %v390_v33 = vshrl.u32 %v2168_v23, 16  ;;  %v392_v34 = vshll.u32 %v2168_v23, 16  ;;  %v528_v36 = vsel %vm525_vm0, %v526_v26, %v527_v27  ;;  %v1969_v38 = vld [vmem:[%s2140_s24 + $0x20] ss:$0 sps:$4 sm:$0x11]   ;;  %v530_v40 = vrot.slane %v1967_v31, 1  ;;  %s203_s21 = sadd.s32 %s1675_s20, %s2676_s19 }
  0x1c   : > { %v399_v37 = vrot.slane %v397_v30, 1  ;;  %550 = vrot.lane.b32.xlu1 %v528_v36, %s2075_s27  ;;  %v529_v39 = vrot.slane %v1767_v32, 1  ;;  %v402_v42 = vshrl.u32 %v2173_v29, 16  ;;  %v786_v44 = vrot.slane %v1969_v38, 1  ;;  %v2186_v48 = vld [vmem:[%s2140_s24 + $0x28] sm:$0xf] }
  0x1d   : > { %v394_v41 = vrot.slane %v392_v34, 1  ;;  %v404_v45 = vshll.u32 %v2173_v29, 16  ;;  %v409_v46 = vshll.u32 %v1967_v31, 16  ;;  %v666_v47 = vshll.u32 %v1969_v38, 16  ;;  %v1718_v53 = vld [vmem:[%s2140_s24 + $0x18] sm:$0xf] }
  0x1e   : > { %v531_v49 = vsel %vm525_vm0, %v529_v39, %v530_v40  ;;  %v647_v51 = vshrl.u32 %v2150_v8, 16  ;;  %v651_v52 = vrot.slane %v649_v13, 1  ;;  %v1719_v56 = vld [vmem:[%s2140_s24 + $0x1c] sm:$0xf]  ;;  %v664_v58 = vor.u32 %v663_v35, %v659_v21  ;;  %v1742_v7 = vld [vmem:[%s2140_s24 + $0x18] sm:$0xe] }
  0x1f   : > { %v395_v50 = vor.u32 %v394_v41, %v390_v33  ;;  %v406_v54 = vrot.slane %v404_v45, 1  ;;  %v411_v55 = vrot.slane %v409_v46, 1  ;;  %v1799_v60 = vcombine.low %v1720_v43, %v2186_v48  ;;  %v2199_v1 = vld [vmem:[%s2140_s24 + $0x2c] ss:$0 sps:$4 sm:$0x11]   ;;  %s1676_s22 = sshll.u32 %s203_s21, 2 }
  0x20   : > { %552 = vrot.lane.b32.xlu1 %v531_v49, %s2075_s27  ;;  %v787_v61 = vsel %vm525_vm0, %v785_v17, %v786_v44  ;;  %v668_v63 = vrot.slane %v666_v47, 1  ;;  %v1798_v0 = vcombine.low %v1718_v53, %v1719_v56  ;;  %v652_v2 = vor.u32 %v651_v52, %v647_v51  ;;  %v1975_v5 = vld [vmem:[%s2140_s24 + $0x20] ss:$0 sps:$4 sm:$0x11]   ;;  %v224_v10 = vld [vmem:[%s2140_s24 + $0x18] sm:$0xf] }
  0x21   : > { %v400_v57 = vsel %vm388_vm1, %v395_v50, %v399_v37  ;;  %v407_v62 = vor.u32 %v406_v54, %v402_v42  ;;  %v656_v3 = vrot.slane %v654_v59, 1  ;;  %v917_v4 = vshll.u32 %v1799_v60, 16  ;;  %v2208_v13 = vld [vmem:[%s2140_s24 + $0x1c] sm:$0xf]  ;;  %v226_v21 = vld [vmem:[%s2140_s24 + $0x24] sm:$0xf] }
  0x22   : > { %485 = vrot.lane.b32.xlu0 %v400_v57, %s2076_s28  ;;  %v905_v8 = vshll.u32 %v1798_v0, 16  ;;  %v915_v9 = vshrl.u32 %v1799_v60, 16  ;;  %v922_v12 = vshll.u32 %v2199_v1, 16  ;;  %v669_v14 = vsel %vm388_vm1, %v664_v58, %v668_v63  ;;  %v2216_v17 = vld [vmem:[%s2140_s24 + $0x20] ss:$0 sps:$4 sm:$0x11]  }
  0x23   : > { %v412_v6 = vsel %vm388_vm1, %v407_v62, %v411_v55  ;;  %v919_v11 = vrot.slane %v917_v4, 1  ;;  %v903_v15 = vshrl.u32 %v1798_v0, 16  ;;  %v2213_v16 = vcombine.low %v224_v10, %v2208_v13  ;;  %v227_v22 = vld [vmem:[%s2140_s24 + $0x28] sm:$0xf]  ;;  %v1743_v37 = vld [vmem:[%s2140_s24 + $0x24] sm:$0xe] }
  0x24   : > { %808 = vrot.lane.b32.xlu1 %v787_v61, %s2074_s26  ;;  %v657_v18 = vsel %vm388_vm1, %v652_v2, %v656_v3  ;;  %v907_v19 = vrot.slane %v905_v8, 1  ;;  %v910_v20 = vshll.u32 %v1975_v5, 16  ;;  %v1814_v24 = vcombine.low %v1742_v7, %v1719_v56  ;;  %v1979_v33 = vld [vmem:[%s2140_s24 + $0x2c] ss:$0 sps:$4 sm:$0x11]   ;;  %s2678_s12 = smov (!%p209_p7, %s2055_s12), 1 }
  0x25   : > { %v416_v25 = vshll.u32 %v2213_v16, 16  ;;  %v920_v26 = vor.u32 %v919_v11, %v915_v9  ;;  %v924_v27 = vrot.slane %v922_v12, 1  ;;  %v421_v28 = vshll.u32 %v2216_v17, 16  ;;  %v247_v42 = vld [vmem:[%s2140_s24 + $0x24] sm:$0xe] }
  0x26   : > { %487 = vrot.lane.b32.xlu0 %v412_v6, %s2076_s28  ;;  %v2224_v30 = vcombine.low %v226_v21, %v227_v22  ;;  %v414_v31 = vshrl.u32 %v2213_v16, 16  ;;  %v908_v34 = vor.u32 %v907_v19, %v903_v15  ;;  %v912_v35 = vrot.slane %v910_v20, 1  ;;  %v246_v47 = vld [vmem:[%s2140_s24 + $0x18] sm:$0xe]  ;;  %v1690_v51 = vld [vmem:[%s2140_s24 + $0x30] sm:$0xf] }
  0x27   : > { %v418_v32 = vrot.slane %v416_v25, 1  ;;  %v925_v38 = vsel %vm388_vm1, %v920_v26, %v924_v27  ;;  %v423_v39 = vrot.slane %v421_v28, 1  ;;  %v1038_v40 = vrot.slane %v1814_v24, 1  ;;  %v1691_v52 = vld [vmem:[%s2140_s24 + $0x34] sm:$0xf] }
  0x28   : > { %744 = vrot.lane.b32.xlu1 %v669_v14, %s2077_s29  ;;  %v428_v36 = vshll.u32 %v2224_v30, 16  ;;  %v1039_v41 = vrot.slane %v1975_v5, 1  ;;  %v426_v44 = vshrl.u32 %v2224_v30, 16  ;;  %v433_v46 = vshll.u32 %v1979_v33, 16  ;;  %v1688_v53 = vld [vmem:[%s2140_s24 + $0x24] sm:$0xf] }
  0x29   : > { %v419_v43 = vor.u32 %v418_v32, %v414_v31  ;;  %v1815_v49 = vcombine.low %v1743_v37, %v2186_v48  ;;  %v913_v50 = vsel %vm388_vm1, %v908_v34, %v912_v35  ;;  %v1689_v54 = vld [vmem:[%s2140_s24 + $0x28] sm:$0xf]  ;;  %v1769_v56 = vcombine.low %v247_v42, %v227_v22  ;;  %v1987_v9 = vld [vmem:[%s2140_s24 + $0x2c] ss:$0 sps:$4 sm:$0x11]  }
  0x2a   : > { %742 = vrot.lane.b32.xlu0 %v657_v18, %s2077_s29  ;;  %v430_v45 = vrot.slane %v428_v36, 1  ;;  %v1040_v55 = vsel %vm525_vm0, %v1038_v40, %v1039_v41  ;;  %v435_v59 = vrot.slane %v433_v46, 1  ;;  %v1777_v48 = vcombine.low %v1690_v51, %v1691_v52  ;;  %v1711_v10 = vld [vmem:[%s2140_s24 + $0x30] sm:$0xe]  ;;  %v1710_v11 = vld [vmem:[%s2140_s24 + $0x24] sm:$0xe] }
  0x2b   : > { %v424_v57 = vsel %vm388_vm1, %v419_v43, %v423_v39  ;;  %v1042_v61 = vrot.slane %v2199_v1, 1  ;;  %v1768_v62 = vcombine.low %v246_v47, %v2208_v13  ;;  %v1776_v63 = vcombine.low %v1688_v53, %v1689_v54  ;;  %v1724_v19 = vld [vmem:[%s2140_s24 + $0x3c] sm:$0xf]  ;;  %v2266_v20 = vld [vmem:[%s2140_s24 + $0x40] sm:$0xf] }
  0x2c   : > { %864 = vrot.lane.b32.xlu1 %v1799_v60, %s2078_s30  ;;  %v431_v58 = vor.u32 %v430_v45, %v426_v44  ;;  %v1041_v60 = vrot.slane %v1815_v49, 1  ;;  %v535_v3 = vrot.slane %v1769_v56, 1  ;;  %v536_v4 = vrot.slane %v1979_v33, 1  ;;  %v1722_v24 = vld [vmem:[%s2140_s24 + $0x30] sm:$0xf] }
  0x2d   : > { %v685_v5 = vshll.u32 %v1777_v48, 16  ;;  %v532_v6 = vrot.slane %v1768_v62, 1  ;;  %v533_v7 = vrot.slane %v2216_v17, 1  ;;  %v673_v8 = vshll.u32 %v1776_v63, 16  ;;  %v1723_v25 = vld [vmem:[%s2140_s24 + $0x34] sm:$0xf] }
  0x2e   : > { %862 = vrot.lane.b32.xlu0 %v1798_v0, %s2078_s30  ;;  %v2251_v0 = vld [vmem:[%s2140_s24 + $0x38] ss:$0 sps:$4 sm:$0x11]   ;;  %v436_v2 = vsel %vm388_vm1, %v431_v58, %v435_v59  ;;  %v1043_v1 = vsel %vm525_vm0, %v1041_v60, %v1042_v61  ;;  %v683_v12 = vshrl.u32 %v1777_v48, 16  ;;  %v537_v14 = vsel %vm525_vm0, %v535_v3, %v536_v4  ;;  %v228_v36 = vld [vmem:[%s2140_s24 + $0x30] sm:$0xf] }
  0x2f   : > { %v690_v13 = vshll.u32 %v2251_v0, 16  ;;  %v687_v15 = vrot.slane %v685_v5, 1  ;;  %v671_v18 = vshrl.u32 %v1776_v63, 16  ;;  %v534_v17 = vsel %vm525_vm0, %v532_v6, %v533_v7  ;;  %v2276_v37 = vld [vmem:[%s2140_s24 + $0x34] sm:$0xf] }
  0x30   : > { %1000 = vrot.lane.b32.xlu1 %v925_v38, %s2079_s4  ;;  %v675_v21 = vrot.slane %v673_v8, 1  ;;  %v678_v22 = vshll.u32 %v1987_v9, 16  ;;  %v1793_v26 = vcombine.low %v1711_v10, %v1691_v52  ;;  %v1792_v27 = vcombine.low %v1710_v11, %v1689_v54  ;;  %v2281_v43 = vld [vmem:[%s2140_s24 + $0x44] ss:$0 sps:$4 sm:$0x11]  }
  0x31   : > { %v1801_v28 = vcombine.low %v1724_v19, %v2266_v20  ;;  %v688_v31 = vor.u32 %v687_v15, %v683_v12  ;;  %v692_v32 = vrot.slane %v690_v13, 1  ;;  %v1800_v33 = vcombine.low %v1722_v24, %v1723_v25  ;;  %v1993_v46 = vld [vmem:[%s2140_s24 + $0x38] ss:$0 sps:$4 sm:$0x11]   ;;  %v231_v51 = vld [vmem:[%s2140_s24 + $0x40] sm:$0xf] }
  0x32   : > { %998 = vrot.lane.b32.xlu0 %v913_v50, %s2079_s4  ;;  %v676_v34 = vor.u32 %v675_v21, %v671_v18  ;;  %v680_v35 = vrot.slane %v678_v22, 1  ;;  %v791_v38 = vrot.slane %v1793_v26, 1  ;;  %v792_v39 = vrot.slane %v2251_v0, 1  ;;  %v230_v50 = vld [vmem:[%s2140_s24 + $0x3c] sm:$0xf] }
  0x33   : > { %v788_v40 = vrot.slane %v1792_v27, 1  ;;  %v789_v41 = vrot.slane %v1987_v9, 1  ;;  %v941_v42 = vshll.u32 %v1801_v28, 16  ;;  %v693_v44 = vsel %vm388_vm1, %v688_v31, %v692_v32  ;;  %v1997_v6 = vld [vmem:[%s2140_s24 + $0x44] ss:$0 sps:$4 sm:$0x11]  }
  0x34   : > { %489 = vrot.lane.b32.xlu1 %v424_v57, %s2076_s28  ;;  %v929_v45 = vshll.u32 %v1800_v33, 16  ;;  %v2287_v47 = vcombine.low %v228_v36, %v2276_v37  ;;  %v681_v49 = vsel %vm388_vm1, %v676_v34, %v680_v35  ;;  %v939_v52 = vshrl.u32 %v1801_v28, 16  ;;  %v1744_v57 = vld [vmem:[%s2140_s24 + $0x30] sm:$0xe]  ;;  %v249_v21 = vld [vmem:[%s2140_s24 + $0x3c] sm:$0xe] }
  0x35   : > { %v943_v53 = vrot.slane %v941_v42, 1  ;;  %v946_v54 = vshll.u32 %v2281_v43, 16  ;;  %v793_v56 = vsel %vm525_vm0, %v791_v38, %v792_v39  ;;  %v2301_v59 = vcombine.low %v230_v50, %v231_v51  ;;  %v1695_v24 = vld [vmem:[%s2140_s24 + $0x4c] sm:$0xf]  ;;  %v1692_v26 = vld [vmem:[%s2140_s24 + $0x3c] sm:$0xf] }
  0x36   : > { %1062 = vrot.lane.b32.xlu0 %v1040_v55, %s2080_s5  ;;  %v2295_v55 = vld [vmem:[%s2140_s24 + $0x38] ss:$0 sps:$4 sm:$0x11]   ;;  %v440_v58 = vshll.u32 %v2287_v47, 16  ;;  %v927_v60 = vshrl.u32 %v1800_v33, 16  ;;  %v931_v61 = vrot.slane %v929_v45, 1  ;;  %v1816_v0 = vcombine.low %v1744_v57, %v1723_v25 }
  0x37   : > { %v934_v62 = vshll.u32 %v1993_v46, 16  ;;  %v948_v3 = vrot.slane %v946_v54, 1  ;;  %v445_v4 = vshll.u32 %v2295_v55, 16  ;;  %v438_v5 = vshrl.u32 %v2287_v47, 16  ;;  %v248_v25 = vld [vmem:[%s2140_s24 + $0x30] sm:$0xe] }
  0x38   : > { %491 = vrot.lane.b32.xlu1 %v436_v2, %s2076_s28  ;;  %v944_v2 = vor.u32 %v943_v53, %v939_v52  ;;  %v452_v7 = vshll.u32 %v2301_v59, 16  ;;  %v932_v8 = vor.u32 %v931_v61, %v927_v60  ;;  %v1044_v13 = vrot.slane %v1816_v0, 1  ;;  %v1693_v27 = vld [vmem:[%s2140_s24 + $0x40] sm:$0xf]  ;;  %v1713_v52 = vld [vmem:[%s2140_s24 + $0x48] sm:$0xe] }
  0x39   : > { %v936_v9 = vrot.slane %v934_v62, 1  ;;  %v447_v12 = vrot.slane %v445_v4, 1  ;;  %v450_v18 = vshrl.u32 %v2301_v59, 16  ;;  %v1771_v31 = vcombine.low %v249_v21, %v231_v51  ;;  %v2338_v51 = vld [vmem:[%s2140_s24 + $0x44] ss:$0 sps:$4 sm:$0x11]  }
  0x3a   : > { %1064 = vrot.lane.b32.xlu0 %v1043_v1, %s2080_s5  ;;  %v442_v1 = vrot.slane %v440_v58, 1  ;;  %v949_v11 = vsel %vm388_vm1, %v944_v2, %v948_v3  ;;  %v454_v19 = vrot.slane %v452_v7, 1  ;;  %v1048_v38 = vrot.slane %v2281_v43, 1  ;;  %v1728_v58 = vld [vmem:[%s2140_s24 + $0x54] sm:$0xf] }
  0x3b   : > { %v937_v22 = vsel %vm388_vm1, %v932_v8, %v936_v9  ;;  %v1770_v39 = vcombine.low %v248_v25, %v2276_v37  ;;  %v541_v42 = vrot.slane %v1771_v31, 1  ;;  %v539_v37 = vrot.slane %v2295_v55, 1  ;;  %v1712_v60 = vld [vmem:[%s2140_s24 + $0x3c] sm:$0xe]  ;;  %v1726_v0 = vld [vmem:[%s2140_s24 + $0x48] sm:$0xf] }
  0x3c   : > { %556 = vrot.lane.b32.xlu1 %v537_v14, %s2075_s27  ;;  %v1045_v14 = vrot.slane %v1993_v46, 1  ;;  %v443_v15 = vor.u32 %v442_v1, %v438_v5  ;;  %v2333_v46 = vld [vmem:[%s2140_s24 + $0x50] ss:$0 sps:$4 sm:$0x11]   ;;  %v2354_v2 = vld [vmem:[%s2140_s24 + $0x4c] sm:$0xf]  ;;  %v1795_v3 = vcombine.low %v1713_v52, %v1695_v24  ;;  %v1794_v5 = vcombine.low %v1712_v60, %v1693_v27 }
  0x3d   : > { %v714_v57 = vshll.u32 %v2333_v46, 16  ;;  %v2362_v9 = vcombine.low %v1726_v0, %v2354_v2  ;;  %v795_v21 = vrot.slane %v2338_v51, 1 }
  0x3e   : > { %554 = vrot.lane.b32.xlu0 %v534_v17, %s2075_s27  ;;  %v457_v17 = vshll.u32 %v1997_v6, 16  ;;  %v448_v32 = vsel %vm388_vm1, %v443_v15, %v447_v12  ;;  %v1046_v36 = vsel %vm525_vm0, %v1044_v13, %v1045_v14  ;;  %v2030_v12 = vld [vmem:[%s2660_s1 + $0x10] ss:$0 sps:$4 sm:$0x33]   ;;  %v797_v13 = vrot.slane %v1795_v3, 1 }
  0x3f   : > { %v798_v14 = vrot.slane %v2333_v46, 1  ;;  %1907 = vmatprep.subr.msk.bf16.mxu0 %vm1251_vm2, %v2030_v12  ;;  %v1253_v31 = vsel %vm1251_vm2, %v2030_v12, 0  ;;  %1908 = vmatprep.subr.msk.bf16.mxu1 %vm1251_vm2, %v2030_v12  ;;  %v1746_v46 = vld [vmem:[%s2140_s24 + $0x48] sm:$0xe]  ;;  %v251_v3 = vld [vmem:[%s2140_s24 + $0x54] sm:$0xe] }
  0x40   : > { %612 = vrot.lane.b32.xlu1 %v1777_v48, %s2073_s25  ;;  %v790_v48 = vsel %vm525_vm0, %v788_v40, %v789_v41  ;;  %v459_v34 = vrot.slane %v457_v17, 1  ;;  %v1778_v40 = vcombine.low %v1692_v26, %v1693_v27  ;;  %v794_v17 = vrot.slane %v1794_v5, 1  ;;  %v234_v27 = vld [vmem:[%s2140_s24 + $0x54] sm:$0xf]  ;;  %1880 = vmatpush3.bf16.msra.mxu0 %v1253_v31 }
  0x41   : > { %v953_v26 = vshll.u32 %v2362_v9, 16  ;;  %1904 = vmatpush3.bf16.msra.mxu1 %v1253_v31  ;;  %v2022_v31 = vld [vmem:[%s2140_s24 + $0x68] ss:$0 sps:$4 sm:$0x11]  }
  0x42   : > { %610 = vrot.lane.b32.xlu0 %v1776_v63, %s2073_s25  ;;  %v1745_v63 = vld [vmem:[%s2140_s24 + $0x3c] sm:$0xe]  ;;  %v697_v50 = vshll.u32 %v1778_v40, 16  ;;  %v695_v61 = vshrl.u32 %v1778_v40, 16 }
  0x43   : > { %v1817_v10 = vcombine.low %v1745_v63, %v2266_v20  ;;  %v1694_v20 = vld [vmem:[%s2140_s24 + $0x48] sm:$0xf]  ;;  %v702_v63 = vshll.u32 %v2338_v51, 16 }
  0x44   : > { %748 = vrot.lane.b32.xlu1 %v693_v44, %s2077_s29  ;;  %v1779_v35 = vcombine.low %v1694_v20, %v1695_v24  ;;  %v542_v44 = vrot.slane %v1997_v6, 1  ;;  %v699_v62 = vrot.slane %v697_v50, 1  ;;  %v716_v6 = vrot.slane %v714_v57, 1  ;;  %v2031_v24 = vld [vmem:[%s2660_s1 + $0x8] sm:$0xff]  }
  0x45   : > { %v704_v8 = vrot.slane %v702_v63, 1  ;;  %1881 = vmatprep.subr.bf16.mxu0 %v2031_v24  ;;  %1902 = vmatprep.subr.bf16.mxu1 %v2031_v24 }
  0x46   : > { %746 = vrot.lane.b32.xlu0 %v681_v49, %s2077_s29  ;;  %v709_v45 = vshll.u32 %v1779_v35, 16  ;;  %v538_v49 = vrot.slane %v1770_v39, 1  ;;  %v707_v53 = vshrl.u32 %v1779_v35, 16  ;;  %v543_v54 = vsel %vm525_vm0, %v541_v42, %v542_v44  ;;  %1882 = vmatpush3.bf16.msra.mxu0 %v2031_v24 }
  0x47   : > { %v700_v7 = vor.u32 %v699_v62, %v695_v61  ;;  %v951_v42 = vshrl.u32 %v2362_v9, 16  ;;  %v955_v44 = vrot.slane %v953_v26, 1  ;;  %1905 = vmatpush3.bf16.msra.mxu1 %v2031_v24 }
  0x48   : > { %812 = vrot.lane.b32.xlu1 %v793_v56, %s2074_s26  ;;  %v711_v56 = vrot.slane %v709_v45, 1  ;;  %v540_v55 = vsel %vm525_vm0, %v538_v49, %v539_v37 }
  0x49   : > { %v705_v25 = vsel %vm388_vm1, %v700_v7, %v704_v8  ;;  %v956_v57 = vor.u32 %v955_v44, %v951_v42  ;;  %v250_v7 = vld [vmem:[%s2140_s24 + $0x48] sm:$0xe]  ;;  %v1696_v8 = vld [vmem:[%s2140_s24 + $0x54] sm:$0xf]  ;;  %v738_v42 = vshll.u32 %v2022_v31, 16 }
  0x4a   : > { %810 = vrot.lane.b32.xlu0 %v790_v48, %s2074_s26  ;;  %v2347_v48 = vld [vmem:[%s2140_s24 + $0x58] sm:$0xf]  ;;  %v712_v1 = vor.u32 %v711_v56, %v707_v53  ;;  %v2015_v53 = vld [vmem:[%s2140_s24 + $0x5c] ss:$0 sps:$4 sm:$0x11]   ;;  %v1818_v56 = vcombine.low %v1746_v46, %v2354_v2 }
  0x4b   : > { %v2358_v4 = vcombine.low %v1728_v58, %v2347_v48  ;;  %v481_v2 = vshll.u32 %v2015_v53, 16  ;;  %v548_v26 = vrot.slane %v2015_v53, 1 }
  0x4c   : > { %868 = vrot.lane.b32.xlu1 %v1801_v28, %s2078_s30  ;;  %v1047_v28 = vrot.slane %v1817_v10, 1  ;;  %v232_v10 = vld [vmem:[%s2140_s24 + $0x48] sm:$0xf]  ;;  %v1050_v5 = vrot.slane %v1818_v56, 1 }
  0x4d   : > { %v965_v15 = vshll.u32 %v2358_v4, 16 }
  0x4e   : > { %866 = vrot.lane.b32.xlu0 %v1800_v33, %s2078_s30  ;;  %v455_v33 = vor.u32 %v454_v19, %v450_v18  ;;  %v1049_v43 = vsel %vm525_vm0, %v1047_v28, %v1048_v38  ;;  %v2375_v18 = vld [vmem:[%s2140_s24 + $0x5c] ss:$0 sps:$4 sm:$0x11]   ;;  %v717_v19 = vsel %vm388_vm1, %v712_v1, %v716_v6  ;;  %v2393_v28 = vld [vmem:[%s2140_s24 + $0x58] sm:$0xf] }
  0x4f   : > { %v2405_v39 = vcombine.low %v234_v27, %v2393_v28  ;;  %v1698_v1 = vld [vmem:[%s2140_s24 + $0x60] sm:$0xf]  ;;  %v1699_v6 = vld [vmem:[%s2140_s24 + $0x64] sm:$0xf]  ;;  %v1773_v12 = vcombine.low %v251_v3, %v2393_v28 }
  0x50   : > { %1004 = vrot.lane.b32.xlu1 %v949_v11, %s2079_s4  ;;  %v460_v41 = vsel %vm388_vm1, %v455_v33, %v459_v34  ;;  %v2366_v11 = vld [vmem:[%s2140_s24 + $0x4c] sm:$0xf]  ;;  %v967_v33 = vrot.slane %v965_v15, 1  ;;  %v970_v34 = vshll.u32 %v2375_v18, 16  ;;  %v483_v15 = vrot.slane %v481_v2, 1 }
  0x51   : > { %v2384_v20 = vcombine.low %v232_v10, %v2366_v11  ;;  %v474_v63 = vshrl.u32 %v2405_v39, 16  ;;  %v1697_v10 = vld [vmem:[%s2140_s24 + $0x58] sm:$0xf]  ;;  %v2028_v2 = vld [vmem:[%s2140_s24 + $0x74] ss:$0 sps:$4 sm:$0x11]  }
  0x52   : > { %1002 = vrot.lane.b32.xlu0 %v937_v22, %s2079_s4  ;;  %v2381_v22 = vld [vmem:[%s2140_s24 + $0x50] ss:$0 sps:$4 sm:$0x11]   ;;  %v972_v37 = vrot.slane %v970_v34, 1  ;;  %v1780_v24 = vcombine.low %v1696_v8, %v1697_v10 }
  0x53   : > { %v464_v38 = vshll.u32 %v2384_v20, 16  ;;  %v958_v45 = vshll.u32 %v2381_v22, 16  ;;  %v462_v51 = vshrl.u32 %v2384_v20, 16  ;;  %v2023_v34 = vld [vmem:[%s2140_s24 + $0x5c] ss:$0 sps:$4 sm:$0x11]  }
  0x54   : > { %493 = vrot.lane.b32.xlu1 %v448_v32, %s2076_s28  ;;  %v963_v32 = vshrl.u32 %v2358_v4, 16  ;;  %v719_v44 = vshrl.u32 %v1780_v24, 16 }
  0x55   : > { %v466_v52 = vrot.slane %v464_v38, 1  ;;  %v960_v58 = vrot.slane %v958_v45, 1  ;;  %v1715_v38 = vld [vmem:[%s2140_s24 + $0x60] sm:$0xe] }
  0x56   : > { %1066 = vrot.lane.b32.xlu0 %v1046_v36, %s2080_s5  ;;  %v799_v36 = vsel %vm525_vm0, %v797_v13, %v798_v14  ;;  %v968_v49 = vor.u32 %v967_v33, %v963_v32 }
  0x57   : > { %v467_v62 = vor.u32 %v466_v52, %v462_v51  ;;  %v1731_v51 = vld [vmem:[%s2140_s24 + $0x64] sm:$0xf]  ;;  %v1797_v52 = vcombine.low %v1715_v38, %v1699_v6 }
  0x58   : > { %495 = vrot.lane.b32.xlu1 %v460_v41, %s2076_s28  ;;  %v796_v41 = vsel %vm525_vm0, %v794_v17, %v795_v21  ;;  %v973_v60 = vsel %vm388_vm1, %v968_v49, %v972_v37  ;;  %v1054_v21 = vrot.slane %v2375_v18, 1  ;;  %v1733_v49 = vld [vmem:[%s2140_s24 + $0x70] sm:$0xf]  ;;  %v1714_v37 = vld [vmem:[%s2140_s24 + $0x54] sm:$0xe] }
  0x5a   : > { %1068 = vrot.lane.b32.xlu0 %v1049_v43, %s2080_s5  ;;  %v1747_v43 = vld [vmem:[%s2140_s24 + $0x54] sm:$0xe] }
  0x5c   : > { %560 = vrot.lane.b32.xlu1 %v543_v54, %s2075_s27  ;;  %v476_v54 = vshll.u32 %v2405_v39, 16 }
  0x5e   : > { %558 = vrot.lane.b32.xlu0 %v540_v55, %s2075_s27  ;;  %v1819_v55 = vcombine.low %v1747_v43, %v2347_v48  ;;  %v478_v0 = vrot.slane %v476_v54, 1  ;;  %v961_v48 = vsel %vm388_vm1, %v956_v57, %v960_v58  ;;  %v1732_v43 = vld [vmem:[%s2140_s24 + $0x6c] sm:$0xf]  ;;  %v740_v54 = vrot.slane %v738_v42, 1 }
  0x5f   : > { %v1805_v56 = vcombine.low %v1732_v43, %v1733_v49  ;;  %v1796_v57 = vcombine.low %v1714_v37, %v1697_v10  ;;  %v994_v10 = vshll.u32 %v2028_v2, 16 }
  0x60   : > { %616 = vrot.lane.b32.xlu1 %v1779_v35, %s2073_s25  ;;  %v2399_v35 = vld [vmem:[%s2140_s24 + $0x50] ss:$0 sps:$4 sm:$0x11]   ;;  %v479_v14 = vor.u32 %v478_v0, %v474_v63  ;;  %v804_v63 = vrot.slane %v2022_v31, 1 }
  0x61   : > { %v469_v50 = vshll.u32 %v2399_v35, 16  ;;  %v545_v18 = vrot.slane %v2399_v35, 1  ;;  %v726_v35 = vshll.u32 %v2023_v34, 16  ;;  %v989_v0 = vshll.u32 %v1805_v56, 16 }
  0x62   : > { %614 = vrot.lane.b32.xlu0 %v1778_v40, %s2073_s25  ;;  %v2032_v40 = vld [vmem:[%s2660_s1] sm:$0xff]   ;;  %v484_v27 = vsel %vm388_vm1, %v479_v14, %v483_v15 }
  0x63   : > { %1883 = vmatprep.subr.bf16.mxu0 %v2032_v40  ;;  %1903 = vmatprep.subr.bf16.mxu1 %v2032_v40  ;;  %v471_v61 = vrot.slane %v469_v50, 1  ;;  %v1730_v50 = vld [vmem:[%s2140_s24 + $0x60] sm:$0xf]  ;;  %v991_v8 = vrot.slane %v989_v0, 1 }
  0x64   : > { %752 = vrot.lane.b32.xlu1 %v717_v19, %s2077_s29  ;;  %1884 = vmatpush3.bf16.msra.mxu0 %v2032_v40  ;;  %v1781_v19 = vcombine.low %v1698_v1, %v1699_v6  ;;  %v2029_v1 = vld [vmem:[%s2140_s24 + $0x68] ss:$0 sps:$4 sm:$0x11]  }
  0x65   : > { %1906 = vmatpush3.bf16.msra.mxu1 %v2032_v40  ;;  %v472_v13 = vsel %vm388_vm1, %v467_v62, %v471_v61  ;;  %v803_v62 = vrot.slane %v1797_v52, 1  ;;  %v982_v15 = vshll.u32 %v2029_v1, 16  ;;  %v1057_v38 = vrot.slane %v2029_v1, 1 }
  0x66   : > { %750 = vrot.lane.b32.xlu0 %v705_v25, %s2077_s29  ;;  %v547_v25 = vrot.slane %v1773_v12, 1  ;;  %v733_v28 = vshll.u32 %v1781_v19, 16  ;;  %v731_v40 = vshrl.u32 %v1781_v19, 16  ;;  %v1749_v12 = vld [vmem:[%s2140_s24 + $0x6c] sm:$0xe] }
  0x67   : > { %v805_v6 = vsel %vm525_vm0, %v803_v62, %v804_v63 }
  0x68   : > { %816 = vrot.lane.b32.xlu1 %v799_v36, %s2074_s26  ;;  %v549_v36 = vsel %vm525_vm0, %v547_v25, %v548_v26  ;;  %v996_v25 = vrot.slane %v994_v10, 1 }
  0x6a   : > { %814 = vrot.lane.b32.xlu0 %v796_v41, %s2074_s26  ;;  %v735_v41 = vrot.slane %v733_v28, 1  ;;  %v984_v28 = vrot.slane %v982_v15, 1 }
  0x6c   : > { %872 = vrot.lane.b32.xlu1 %v2358_v4, %s2078_s30  ;;  %v1051_v4 = vrot.slane %v2381_v22, 1  ;;  %v1772_v22 = vcombine.low %v250_v7, %v2366_v11  ;;  %v721_v11 = vshll.u32 %v1780_v24, 16  ;;  %v736_v53 = vor.u32 %v735_v41, %v731_v40 }
  0x6d   : > { %v987_v7 = vshrl.u32 %v1805_v56, 16 }
  0x6e   : > { %870 = vrot.lane.b32.xlu0 %v2362_v9, %s2078_s30  ;;  %v1053_v9 = vrot.slane %v1819_v55, 1  ;;  %v1052_v17 = vsel %vm525_vm0, %v1050_v5, %v1051_v4  ;;  %v544_v33 = vrot.slane %v1772_v22, 1  ;;  %v723_v46 = vrot.slane %v721_v11, 1 }
  0x6f   : > { %v728_v55 = vrot.slane %v726_v35, 1  ;;  %v741_v61 = vsel %vm388_vm1, %v736_v53, %v740_v54  ;;  %v801_v5 = vrot.slane %v2023_v34, 1  ;;  %v1821_v22 = vcombine.low %v1749_v12, %v1733_v49 }
  0x70   : > { %1008 = vrot.lane.b32.xlu1 %v973_v60, %s2079_s4  ;;  %v1055_v32 = vsel %vm525_vm0, %v1053_v9, %v1054_v21  ;;  %v546_v45 = vsel %vm525_vm0, %v544_v33, %v545_v18  ;;  %v724_v58 = vor.u32 %v723_v46, %v719_v44  ;;  %v1804_v60 = vcombine.low %v1730_v50, %v1731_v51 }
  0x71   : > { %v1059_v33 = vrot.slane %v1821_v22, 1  ;;  %v1060_v18 = vrot.slane %v2028_v2, 1 }
  0x72   : > { %1006 = vrot.lane.b32.xlu0 %v961_v48, %s2079_s4  ;;  %v729_v3 = vsel %vm388_vm1, %v724_v58, %v728_v55  ;;  %v800_v48 = vrot.slane %v1796_v57, 1  ;;  %v977_v4 = vshll.u32 %v1804_v60, 16 }
  0x73   : > { %v1061_v40 = vsel %vm525_vm0, %v1059_v33, %v1060_v18 }
  0x74   : > { %497 = vrot.lane.b32.xlu1 %v472_v13, %s2076_s28  ;;  %v802_v9 = vsel %vm525_vm0, %v800_v48, %v801_v5  ;;  %v975_v13 = vshrl.u32 %v1804_v60, 16  ;;  %v979_v14 = vrot.slane %v977_v4, 1 }
  0x76   : > { %1070 = vrot.lane.b32.xlu0 %v1052_v17, %s2080_s5 }
  0x78   : > { %499 = vrot.lane.b32.xlu1 %v484_v27, %s2076_s28  ;;  %v980_v27 = vor.u32 %v979_v14, %v975_v13 }
  0x7a   : > { %1072 = vrot.lane.b32.xlu0 %v1055_v32, %s2080_s5  ;;  %v985_v34 = vsel %vm388_vm1, %v980_v27, %v984_v28 }
  0x7c   : > { %564 = vrot.lane.b32.xlu1 %v549_v36, %s2075_s27 }
  0x7e   : > { %562 = vrot.lane.b32.xlu0 %v546_v45, %s2075_s27 }
  0x80   : > { %620 = vrot.lane.b32.xlu1 %v1781_v19, %s2073_s25  ;;  %v1748_v19 = vld [vmem:[%s2140_s24 + $0x60] sm:$0xe] }
  0x81   : > { %v1820_v26 = vcombine.low %v1748_v19, %v1731_v51 }
  0x82   : > { %618 = vrot.lane.b32.xlu0 %v1780_v24, %s2073_s25  ;;  %v992_v24 = vor.u32 %v991_v8, %v987_v7  ;;  %s2572_s25 = scalar_lea.vmem %s2661_s2, %s1676_s22 }
  0x83   : > { %v1056_v36 = vrot.slane %v1820_v26, 1 }
  0x84   : > { %756 = vrot.lane.b32.xlu1 %v741_v61, %s2077_s29  ;;  %v997_v32 = vsel %vm388_vm1, %v992_v24, %v996_v25 }
  0x85   : > { %v1058_v42 = vsel %vm525_vm0, %v1056_v36, %v1057_v38 }
  0x86   : > { %754 = vrot.lane.b32.xlu0 %v729_v3, %s2077_s29 }
  0x88   : > { %820 = vrot.lane.b32.xlu1 %v805_v6, %s2074_s26  ;;  %v609_v17 = vpop.permute.xlu1 %608 }
  0x89   : > { %v607_v21 = vpop.permute.xlu0 %606 }
  0x8a   : > { %818 = vrot.lane.b32.xlu0 %v802_v9, %s2074_s26  ;;  %s1677_s26 = sshll.u32 %s2674_s13, 1 }
  0x8b   : > { %s212_s27 = sadd.s32 %s1677_s26, %s2678_s12 }
  0x8c   : > { %876 = vrot.lane.b32.xlu1 %v1805_v56, %s2078_s30  ;;  %s1678_s28 = sshll.u32 %s212_s27, 1 }
  0x8d   : > { %v807_v31 = vpop.permute.xlu0 %806 }
  0x8e   : > { %874 = vrot.lane.b32.xlu0 %v1804_v60, %s2078_s30  ;;  %v551_v11 = vpop.permute.xlu1 %550 }
  0x90   : > { %1012 = vrot.lane.b32.xlu1 %v997_v32, %s2079_s4 }
  0x92   : > { %1010 = vrot.lane.b32.xlu0 %v985_v34, %s2079_s4  ;;  %v553_v41 = vpop.permute.xlu1 %552  ;;  %s214_s4 = scalar_lea.vmem %s2662_s3, %s1678_s28 }
  0x94   : > { %v486_v44 = vpop.permute.xlu0 %485  ;;  %1076 = vrot.lane.b32.xlu1 %v1061_v40, %s2080_s5 }
  0x95   : > { %v1080_v43 = vsel %vm1078_vm3, %v2168_v23, %v486_v44 }
  0x96   : > { %1074 = vrot.lane.b32.xlu0 %v1058_v42, %s2080_s5  ;;  %v809_v45 = vpop.permute.xlu1 %808  ;;  %v1097_v50 = vsel %vm1095_vm4, %v1080_v43, %v551_v11 }
  0x97   : > { %v1114_v54 = vsel %vm1112_vm5, %v1097_v50, %v607_v21 }
  0x98   : > { %v488_v46 = vpop.permute.xlu0 %487 }
  0x99   : > { %v1082_v37 = vsel %vm1078_vm3, %v2173_v29, %v488_v46 }
  0x9a   : > { %v745_v35 = vpop.permute.xlu1 %744  ;;  %v1099_v53 = vsel %vm1095_vm4, %v1082_v37, %v553_v41 }
  0x9b   : > { %v1116_v23 = vsel %vm1112_vm5, %v1099_v53, %v609_v17 }
  0x9c   : > { %v743_v49 = vpop.permute.xlu0 %742  ;;  %v1133_v55 = vsel %vm1129_vm6, %v1116_v23, %v745_v35 }
  0x9d   : > { %v1131_v56 = vsel %vm1129_vm6, %v1114_v54, %v743_v49  ;;  %v1150_v2 = vsel %vm1146_vm7, %v1133_v55, %v809_v45 }
  0x9e   : > { %v865_v51 = vpop.permute.xlu1 %864  ;;  %v1148_v29 = vsel %vm1146_vm7, %v1131_v56, %v807_v31 }
  0x9f   : > { %v1167_v3 = vsel %vm1163_vm8, %v1150_v2, %v865_v51 }
  0xa0   : > { %v863_v52 = vpop.permute.xlu0 %862 }
  0xa1   : > { %v1165_v60 = vsel %vm1163_vm8, %v1148_v29, %v863_v52 }
  0xa2   : > { %v1001_v57 = vpop.permute.xlu1 %1000 }
  0xa3   : > { %v1184_v5 = vsel %vm1180_vm9, %v1167_v3, %v1001_v57 }
  0xa4   : > { %v999_v58 = vpop.permute.xlu0 %998 }
  0xa5   : > { %v1182_v62 = vsel %vm1180_vm9, %v1165_v60, %v999_v58 }
  0xa6   : > { %v490_v61 = vpop.permute.xlu1 %489 }
  0xa7   : > { %v1084_v17 = vsel %vm1078_vm3, %v2213_v16, %v490_v61 }
  0xa8   : > { %v1063_v63 = vpop.permute.xlu0 %1062 }
  0xa9   : > { %v1199_v0 = vsel %vm1197_vm10, %v1182_v62, %v1063_v63 }
  0xaa   : > { %1885 = vmatprep.mubr.msk.bf16.mxu0 %vm1234_vm11, %v1199_v0  ;;  %v492_v48 = vpop.permute.xlu1 %491 }
  0xab   : > { %v1086_v27 = vsel %vm1078_vm3, %v2224_v30, %v492_v48 }
  0xac   : > { %v1065_v4 = vpop.permute.xlu0 %1064 }
  0xad   : > { %v1201_v1 = vsel %vm1197_vm10, %v1184_v5, %v1065_v4 }
  0xae   : > { %1886 = vmatmul.mubr.msk.bf16.vlgmr.msra.gmra.mxu0 %vm1234_vm11, %v1201_v1  ;;  %v557_v6 = vpop.permute.xlu1 %556 }
  0xaf   : > { %v1103_v31 = vsel %vm1095_vm4, %v1086_v27, %v557_v6 }
  0xb0   : > { %v555_v7 = vpop.permute.xlu0 %554 }
  0xb1   : > { %v1101_v21 = vsel %vm1095_vm4, %v1084_v17, %v555_v7 }
  0xb2   : > { %v613_v8 = vpop.permute.xlu1 %612 }
  0xb3   : > { %v1120_v16 = vsel %vm1112_vm5, %v1103_v31, %v613_v8 }
  0xb4   : > { %v611_v10 = vpop.permute.xlu0 %610 }
  0xb5   : > { %v1118_v24 = vsel %vm1112_vm5, %v1101_v21, %v611_v10 }
  0xb6   : > { %v749_v9 = vpop.permute.xlu1 %748 }
  0xb7   : > { %v1137_v34 = vsel %vm1129_vm6, %v1120_v16, %v749_v9 }
  0xb8   : > { %v747_v12 = vpop.permute.xlu0 %746 }
  0xb9   : > { %v1135_v26 = vsel %vm1129_vm6, %v1118_v24, %v747_v12 }
  0xba   : > { %v813_v13 = vpop.permute.xlu1 %812 }
  0xbb   : > { %v1154_v38 = vsel %vm1146_vm7, %v1137_v34, %v813_v13 }
  0xbc   : > { %v811_v14 = vpop.permute.xlu0 %810 }
  0xbd   : > { %v1152_v28 = vsel %vm1146_vm7, %v1135_v26, %v811_v14 }
  0xbe   : > { %v869_v15 = vpop.permute.xlu1 %868 }
  0xbf   : > { %v1171_v30 = vsel %vm1163_vm8, %v1154_v38, %v869_v15 }
  0xc0   : > { %v867_v19 = vpop.permute.xlu0 %866 }
  0xc1   : > { %v1169_v32 = vsel %vm1163_vm8, %v1152_v28, %v867_v19 }
  0xc2   : > { %v1005_v22 = vpop.permute.xlu1 %1004 }
  0xc3   : > { %v1188_v41 = vsel %vm1180_vm9, %v1171_v30, %v1005_v22 }
  0xc4   : > { %v1003_v25 = vpop.permute.xlu0 %1002 }
  0xc5   : > { %v1186_v18 = vsel %vm1180_vm9, %v1169_v32, %v1003_v25 }
  0xc6   : > { %v494_v33 = vpop.permute.xlu1 %493 }
  0xc7   : > { %v1088_v54 = vsel %vm1078_vm3, %v2287_v47, %v494_v33 }
  0xc8   : > { %v1067_v11 = vpop.permute.xlu0 %1066 }
  0xc9   : > { %v1203_v36 = vsel %vm1197_vm10, %v1186_v18, %v1067_v11 }
  0xca   : > { %1889 = vmatprep.mubr.msk.bf16.mxu0 %vm1234_vm11, %v1203_v36  ;;  %v496_v40 = vpop.permute.xlu1 %495 }
  0xcb   : > { %v1090_v55 = vsel %vm1078_vm3, %v2301_v59, %v496_v40 }
  0xcc   : > { %v1069_v42 = vpop.permute.xlu0 %1068 }
  0xcd   : > { %v1205_v44 = vsel %vm1197_vm10, %v1188_v41, %v1069_v42 }
  0xce   : > { %1890 = vmatmul.mubr.msk.bf16.gmra.mxu0 %vm1234_vm11, %v1205_v44  ;;  %v561_v45 = vpop.permute.xlu1 %560 }
  0xcf   : > { %v1107_v61 = vsel %vm1095_vm4, %v1090_v55, %v561_v45 }
  0xd0   : > { %v559_v46 = vpop.permute.xlu0 %558 }
  0xd1   : > { %v1105_v56 = vsel %vm1095_vm4, %v1088_v54, %v559_v46 }
  0xd2   : > { %v617_v35 = vpop.permute.xlu1 %616 }
  0xd3   : > { %v1124_v47 = vsel %vm1112_vm5, %v1107_v61, %v617_v35 }
  0xd4   : > { %v615_v43 = vpop.permute.xlu0 %614 }
  0xd5   : > { %v1122_v23 = vsel %vm1112_vm5, %v1105_v56, %v615_v43 }
  0xd6   : > { %v753_v49 = vpop.permute.xlu1 %752 }
  0xd7   : > { %v1141_v3 = vsel %vm1129_vm6, %v1124_v47, %v753_v49 }
  0xd8   : > { %v751_v37 = vpop.permute.xlu0 %750 }
  0xd9   : > { %v1139_v29 = vsel %vm1129_vm6, %v1122_v23, %v751_v37 }
  0xda   : > { %v817_v50 = vpop.permute.xlu1 %816 }
  0xdb   : > { %v1158_v5 = vsel %vm1146_vm7, %v1141_v3, %v817_v50 }
  0xdc   : > { %v815_v51 = vpop.permute.xlu0 %814 }
  0xdd   : > { %v1156_v60 = vsel %vm1146_vm7, %v1139_v29, %v815_v51 }
  0xde   : > { %v873_v52 = vpop.permute.xlu1 %872 }
  0xdf   : > { %v1175_v59 = vsel %vm1163_vm8, %v1158_v5, %v873_v52 }
  0xe0   : > { %v871_v53 = vpop.permute.xlu0 %870 }
  0xe1   : > { %v1173_v62 = vsel %vm1163_vm8, %v1156_v60, %v871_v53 }
  0xe2   : > { %v1009_v57 = vpop.permute.xlu1 %1008 }
  0xe3   : > { %v1192_v1 = vsel %vm1180_vm9, %v1175_v59, %v1009_v57 }
  0xe4   : > { %v1007_v58 = vpop.permute.xlu0 %1006 }
  0xe5   : > { %v1190_v0 = vsel %vm1180_vm9, %v1173_v62, %v1007_v58 }
  0xe6   : > { %v498_v63 = vpop.permute.xlu1 %497 }
  0xe7   : > { %v1092_v24 = vsel %vm1078_vm3, %v2384_v20, %v498_v63 }
  0xe8   : > { %v1071_v2 = vpop.permute.xlu0 %1070 }
  0xe9   : > { %v1207_v48 = vsel %vm1197_vm10, %v1190_v0, %v1071_v2 }
  0xea   : > { %1893 = vmatprep.mubr.msk.bf16.mxu1 %vm1234_vm11, %v1207_v48  ;;  %v500_v4 = vpop.permute.xlu1 %499 }
  0xeb   : > { %v1094_v22 = vsel %vm1078_vm3, %v2405_v39, %v500_v4 }
  0xec   : > { %v1073_v6 = vpop.permute.xlu0 %1072 }
  0xed   : > { %v1209_v7 = vsel %vm1197_vm10, %v1192_v1, %v1073_v6 }
  0xee   : > { %1894 = vmatmul.mubr.msk.bf16.vlgmr.msra.gmra.mxu1 %vm1234_vm11, %v1209_v7  ;;  %v565_v8 = vpop.permute.xlu1 %564 }
  0xef   : > { %v1111_v25 = vsel %vm1095_vm4, %v1094_v22, %v565_v8 }
  0xf0   : > { %v563_v10 = vpop.permute.xlu0 %562 }
  0xf1   : > { %v1109_v26 = vsel %vm1095_vm4, %v1092_v24, %v563_v10 }
  0xf2   : > { %v621_v9 = vpop.permute.xlu1 %620 }
  0xf3   : > { %v1128_v27 = vsel %vm1112_vm5, %v1111_v25, %v621_v9 }
  0xf4   : > { %v619_v12 = vpop.permute.xlu0 %618 }
  0xf5   : > { %v1126_v31 = vsel %vm1112_vm5, %v1109_v26, %v619_v12 }
  0xf6   : > { %v757_v13 = vpop.permute.xlu1 %756 }
  0xf7   : > { %v1145_v32 = vsel %vm1129_vm6, %v1128_v27, %v757_v13 }
  0xf8   : > { %v755_v14 = vpop.permute.xlu0 %754 }
  0xf9   : > { %v1143_v16 = vsel %vm1129_vm6, %v1126_v31, %v755_v14 }
  0xfa   : > { %v821_v15 = vpop.permute.xlu1 %820 }
  0xfb   : > { %v1162_v39 = vsel %vm1146_vm7, %v1145_v32, %v821_v15 }
  0xfc   : > { %v819_v19 = vpop.permute.xlu0 %818 }
  0xfd   : > { %v1160_v20 = vsel %vm1146_vm7, %v1143_v16, %v819_v19 }
  0xfe   : > { %v877_v17 = vpop.permute.xlu1 %876 }
  0xff   : > { %v1179_v18 = vsel %vm1163_vm8, %v1162_v39, %v877_v17 }
 0x100   : > { %v875_v21 = vpop.permute.xlu0 %874 }
 0x101   : > { %v1177_v11 = vsel %vm1163_vm8, %v1160_v20, %v875_v21 }
 0x102   : > { %v1013_v28 = vpop.permute.xlu1 %1012 }
 0x103   : > { %v1196_v34 = vsel %vm1180_vm9, %v1179_v18, %v1013_v28 }
 0x104   : > { %v1011_v33 = vpop.permute.xlu0 %1010 }
 0x105   : > { %v1194_v38 = vsel %vm1180_vm9, %v1177_v11, %v1011_v33 }
 0x106   : > { %v1077_v36 = vpop.permute.xlu1 %1076 }
 0x107   : > { %v1213_v30 = vsel %vm1197_vm10, %v1196_v34, %v1077_v36 }
 0x108   : > { %v1075_v40 = vpop.permute.xlu0 %1074 }
 0x109   : > { %v1211_v41 = vsel %vm1197_vm10, %v1194_v38, %v1075_v40 }
 0x10a   : > { %1897 = vmatprep.mubr.msk.bf16.mxu1 %vm1234_vm11, %v1211_v41 }
 0x10b   : > { %1898 = vmatmul.mubr.msk.bf16.gmra.mxu1 %vm1234_vm11, %v1213_v30 }
 0x16e   : > { %v1887_v42 = vpop.f32.mrf.mxu0 }
 0x16f   : > { %v1854_v44 = vpack.c.bf16 %v1887_v42, %v1887_v42  ;;  %v1472_v37 = vmul.f32 %v1887_v42, %v1887_v42  ;;  %v1436_v57 = vsel %vm1197_vm10, %v1887_v42, 0.0 }
 0x170   : > { %v1289_v45 = vpop.f32.mrf.mxu0 }
 0x171   : > { %1419 = vst.msk [vmem:[%s2572_s25 + $0x8] sm:$0xf] %vm1416_vm12, %v1854_v44  ;;  %v1852_v46 = vpack.c.bf16 %v1289_v45, %v1289_v45  ;;  %v1470_v43 = vmul.f32 %v1289_v45, %v1289_v45  ;;  %v1433_v51 = vsel %vm1197_vm10, %v1289_v45, 0.0  ;;  %v1489_v61 = vsel %vm1197_vm10, %v1472_v37, 0.0 }
 0x172   : > { %v1888_v35 = vpop.f32.mrf.mxu0 }
 0x173   : > { %1417 = vst.msk [vmem:[%s2572_s25] sm:$0xf] %vm1416_vm12, %v1852_v46  ;;  %v1855_v49 = vpack.c.bf16 %v1888_v35, %v1888_v35  ;;  %v1486_v23 = vsel %vm1197_vm10, %v1470_v43, 0.0  ;;  %v1473_v58 = vmul.f32 %v1888_v35, %v1888_v35  ;;  %v1438_v62 = vsel %vm1197_vm10, %v1888_v35, 0.0 }
 0x174   : > { %v1292_v50 = vpop.f32.mrf.mxu0 }
 0x175   : > { %1420 = vst.msk [vmem:[%s2572_s25 + $0xc] sm:$0xf] %vm1416_vm12, %v1855_v49  ;;  %v1853_v52 = vpack.c.bf16 %v1292_v50, %v1292_v50  ;;  %v1434_v53 = vsel %vm1197_vm10, %v1292_v50, 0.0  ;;  %v1471_v54 = vmul.f32 %v1292_v50, %v1292_v50  ;;  %v1491_v0 = vsel %vm1197_vm10, %v1473_v58, 0.0 }
 0x176   : > { %v1435_v56 = vadd.f32 %v1434_v53, %v1433_v51 }
 0x177   : > { %1418 = vst.msk [vmem:[%s2572_s25 + $0x4] sm:$0xf] %vm1416_vm12, %v1853_v52  ;;  %v1487_v29 = vsel %vm1197_vm10, %v1471_v54, 0.0 }
 0x178   : > { %v1437_v55 = vadd.f32 %v1436_v57, %v1435_v56  ;;  %v1488_v60 = vadd.f32 %v1487_v29, %v1486_v23 }
 0x17a   : > { %v1490_v63 = vadd.f32 %v1489_v61, %v1488_v60  ;;  %v1439_v47 = vadd.f32 %v1438_v62, %v1437_v55 }
 0x17c   : > { %v1492_v2 = vadd.f32 %v1491_v0, %v1490_v63 }
 0x18e   : > { %v1891_v3 = vpop.f32.mrf.mxu0 }
 0x18f   : > { %v1858_v48 = vpack.c.bf16 %v1891_v3, %v1891_v3  ;;  %v1476_v32 = vmul.f32 %v1891_v3, %v1891_v3  ;;  %v1444_v16 = vsel %vm1197_vm10, %v1891_v3, 0.0 }
 0x190   : > { %v1305_v5 = vpop.f32.mrf.mxu0 }
 0x191   : > { %1423 = vst.msk [vmem:[%s2572_s25 + $0x18] sm:$0xf] %vm1416_vm12, %v1858_v48  ;;  %v1856_v59 = vpack.c.bf16 %v1305_v5, %v1305_v5  ;;  %v1474_v15 = vmul.f32 %v1305_v5, %v1305_v5  ;;  %v1440_v21 = vsel %vm1197_vm10, %v1305_v5, 0.0  ;;  %v1497_v20 = vsel %vm1197_vm10, %v1476_v32, 0.0 }
 0x192   : > { %v1892_v4 = vpop.f32.mrf.mxu0  ;;  %v1441_v26 = vadd.f32 %v1440_v21, %v1439_v47 }
 0x193   : > { %1421 = vst.msk [vmem:[%s2572_s25 + $0x10] sm:$0xf] %vm1416_vm12, %v1856_v59  ;;  %v1859_v1 = vpack.c.bf16 %v1892_v4, %v1892_v4  ;;  %v1493_v24 = vsel %vm1197_vm10, %v1474_v15, 0.0  ;;  %v1477_v18 = vmul.f32 %v1892_v4, %v1892_v4  ;;  %v1446_v36 = vsel %vm1197_vm10, %v1892_v4, 0.0 }
 0x194   : > { %v1308_v6 = vpop.f32.mrf.mxu0  ;;  %v1494_v28 = vadd.f32 %v1493_v24, %v1492_v2 }
 0x195   : > { %1424 = vst.msk [vmem:[%s2572_s25 + $0x1c] sm:$0xf] %vm1416_vm12, %v1859_v1  ;;  %v1857_v7 = vpack.c.bf16 %v1308_v6, %v1308_v6  ;;  %v1475_v22 = vmul.f32 %v1308_v6, %v1308_v6  ;;  %v1442_v25 = vsel %vm1197_vm10, %v1308_v6, 0.0  ;;  %v1499_v41 = vsel %vm1197_vm10, %v1477_v18, 0.0 }
 0x196   : > { %v1443_v31 = vadd.f32 %v1442_v25, %v1441_v26 }
 0x197   : > { %1422 = vst.msk [vmem:[%s2572_s25 + $0x14] sm:$0xf] %vm1416_vm12, %v1857_v7  ;;  %v1495_v27 = vsel %vm1197_vm10, %v1475_v22, 0.0 }
 0x198   : > { %v1496_v33 = vadd.f32 %v1495_v27, %v1494_v28  ;;  %v1445_v39 = vadd.f32 %v1444_v16, %v1443_v31 }
 0x19a   : > { %v1498_v34 = vadd.f32 %v1497_v20, %v1496_v33  ;;  %v1447_v40 = vadd.f32 %v1446_v36, %v1445_v39 }
 0x19c   : > { %v1500_v46 = vadd.f32 %v1499_v41, %v1498_v34 }
 0x1ae   : > { %v1895_v8 = vpop.f32.mrf.mxu1 }
 0x1af   : > { %v1862_v10 = vpack.c.bf16 %v1895_v8, %v1895_v8  ;;  %v1480_v37 = vmul.f32 %v1895_v8, %v1895_v8  ;;  %v1452_v51 = vsel %vm1197_vm10, %v1895_v8, 0.0 }
 0x1b0   : > { %v1321_v9 = vpop.f32.mrf.mxu1 }
 0x1b1   : > { %1427 = vst.msk [vmem:[%s2572_s25 + $0x28] sm:$0xf] %vm1416_vm12, %v1862_v10  ;;  %v1860_v12 = vpack.c.bf16 %v1321_v9, %v1321_v9  ;;  %v1478_v11 = vmul.f32 %v1321_v9, %v1321_v9  ;;  %v1448_v38 = vsel %vm1197_vm10, %v1321_v9, 0.0  ;;  %v1505_v54 = vsel %vm1197_vm10, %v1480_v37, 0.0 }
 0x1b2   : > { %v1896_v13 = vpop.f32.mrf.mxu1  ;;  %v1449_v45 = vadd.f32 %v1448_v38, %v1447_v40 }
 0x1b3   : > { %1425 = vst.msk [vmem:[%s2572_s25 + $0x20] sm:$0xf] %vm1416_vm12, %v1860_v12  ;;  %v1863_v14 = vpack.c.bf16 %v1896_v13, %v1896_v13  ;;  %v1501_v42 = vsel %vm1197_vm10, %v1478_v11, 0.0  ;;  %v1481_v56 = vmul.f32 %v1896_v13, %v1896_v13  ;;  %v1454_v29 = vsel %vm1197_vm10, %v1896_v13, 0.0 }
 0x1b4   : > { %v1324_v19 = vpop.f32.mrf.mxu1  ;;  %v1502_v43 = vadd.f32 %v1501_v42, %v1500_v46 }
 0x1b5   : > { %1428 = vst.msk [vmem:[%s2572_s25 + $0x2c] sm:$0xf] %vm1416_vm12, %v1863_v14  ;;  %v1861_v17 = vpack.c.bf16 %v1324_v19, %v1324_v19  ;;  %v1479_v30 = vmul.f32 %v1324_v19, %v1324_v19  ;;  %v1450_v44 = vsel %vm1197_vm10, %v1324_v19, 0.0  ;;  %v1507_v47 = vsel %vm1197_vm10, %v1481_v56, 0.0 }
 0x1b6   : > { %v1451_v49 = vadd.f32 %v1450_v44, %v1449_v45 }
 0x1b7   : > { %1426 = vst.msk [vmem:[%s2572_s25 + $0x24] sm:$0xf] %vm1416_vm12, %v1861_v17  ;;  %v1503_v35 = vsel %vm1197_vm10, %v1479_v30, 0.0 }
 0x1b8   : > { %v1504_v50 = vadd.f32 %v1503_v35, %v1502_v43  ;;  %v1453_v52 = vadd.f32 %v1452_v51, %v1451_v49 }
 0x1ba   : > { %v1506_v23 = vadd.f32 %v1505_v54, %v1504_v50  ;;  %v1455_v62 = vadd.f32 %v1454_v29, %v1453_v52 }
 0x1bc   : > { %v1508_v48 = vadd.f32 %v1507_v47, %v1506_v23 }
 0x1cb   : > { %v1899_v53 = vpop.f32.mrf.mxu1 }
 0x1cc   : > { %v1866_v57 = vpack.c.bf16 %v1899_v53, %v1899_v53  ;;  %v1484_v59 = vmul.f32 %v1899_v53, %v1899_v53  ;;  %v1460_v10 = vsel %vm1197_vm10, %v1899_v53, 0.0 }
 0x1cd   : > { %v1337_v58 = vpop.f32.mrf.mxu1 }
 0x1ce   : > { %1431 = vst.msk [vmem:[%s2572_s25 + $0x38] sm:$0xf] %vm1416_vm12, %v1866_v57  ;;  %v1864_v55 = vpack.c.bf16 %v1337_v58, %v1337_v58  ;;  %v1456_v60 = vsel %vm1197_vm10, %v1337_v58, 0.0  ;;  %v1482_v61 = vmul.f32 %v1337_v58, %v1337_v58  ;;  %v1513_v15 = vsel %vm1197_vm10, %v1484_v59, 0.0 }
 0x1cf   : > { %v1900_v63 = vpop.f32.mrf.mxu1  ;;  %v1457_v3 = vadd.f32 %v1456_v60, %v1455_v62 }
 0x1d0   : > { %1429 = vst.msk [vmem:[%s2572_s25 + $0x30] sm:$0xf] %vm1416_vm12, %v1864_v55  ;;  %v1509_v0 = vsel %vm1197_vm10, %v1482_v61, 0.0  ;;  %v1867_v2 = vpack.c.bf16 %v1900_v63, %v1900_v63  ;;  %v1485_v9 = vmul.f32 %v1900_v63, %v1900_v63  ;;  %v1462_v19 = vsel %vm1197_vm10, %v1900_v63, 0.0 }
 0x1d1   : > { %v1340_v5 = vpop.f32.mrf.mxu1  ;;  %v1510_v7 = vadd.f32 %v1509_v0, %v1508_v48 }
 0x1d2   : > { %1432 = vst.msk [vmem:[%s2572_s25 + $0x3c] sm:$0xf] %vm1416_vm12, %v1867_v2  ;;  %v1865_v4 = vpack.c.bf16 %v1340_v5, %v1340_v5  ;;  %v1458_v1 = vsel %vm1197_vm10, %v1340_v5, 0.0  ;;  %v1483_v6 = vmul.f32 %v1340_v5, %v1340_v5  ;;  %v1515_v22 = vsel %vm1197_vm10, %v1485_v9, 0.0 }
 0x1d3   : > { %v1459_v8 = vadd.f32 %v1458_v1, %v1457_v3 }
 0x1d4   : > { %1430 = vst.msk [vmem:[%s2572_s25 + $0x34] sm:$0xf] %vm1416_vm12, %v1865_v4  ;;  %v1511_v12 = vsel %vm1197_vm10, %v1483_v6, 0.0 }
 0x1d5   : > { %v1461_v13 = vadd.f32 %v1460_v10, %v1459_v8  ;;  %v1512_v14 = vadd.f32 %v1511_v12, %v1510_v7 }
 0x1d7   : > { %v1463_v17 = vadd.f32 %v1462_v19, %v1461_v13  ;;  %v1514_v21 = vadd.f32 %v1513_v15, %v1512_v14 }
 0x1d9   : > { %v1464_v24 = vrot.slane %v1463_v17, 4  ;;  %v1516_v25 = vadd.f32 %v1515_v22, %v1514_v21 }
 0x1db   : > { %v1465_v26 = vadd.f32 %v1464_v24, %v1463_v17  ;;  %v1517_v27 = vrot.slane %v1516_v25, 4 }
 0x1dd   : > { %v1466_v28 = vrot.slane %v1465_v26, 2  ;;  %v1518_v31 = vadd.f32 %v1517_v27, %v1516_v25 }
 0x1df   : > { %v1467_v32 = vadd.f32 %v1466_v28, %v1465_v26  ;;  %v1519_v33 = vrot.slane %v1518_v31, 2 }
 0x1e1   : > { %v1468_v16 = vrot.slane %v1467_v32, 1  ;;  %v1520_v39 = vadd.f32 %v1519_v33, %v1518_v31 }
 0x1e3   : > { %v1521_v20 = vrot.slane %v1520_v39, 1  ;;  %v1469_v18 = vadd.f32 %v1468_v16, %v1467_v32 }
 0x1e5   : > { %v1522_v11 = vadd.f32 %v1521_v20, %v1520_v39 }
 0x1e7   : > { %v1524_v34 = vsel %vm1523_vm13, %v1469_v18, %v1522_v11 }
 0x1e8   : > { %1526 = vst.msk [vmem:[%s214_s4] sm:$0x3] %vm1525_vm14, %v1524_v34 }
 0x1e9 PF: > { %s14_s16 = sadd.s32 1, %s2071_s16   ;;  %s2663_s12 = smov %s2063_s14 }
 0x1ea   : > { %p11_p8 = scmp.ge.s32.totalorder %s14_s16, 6   ;;  %s2664_s13 = smov %s2067_s15 }
 0x1eb   : > { %s2665_s14 = smov %s2668_s17  ;;  %s2666_s15 = smov %s2672_s18 }
 0x1ec   :  { %13 = sbr.rel (!%p11_p8) target bundleno = 3 (0x3), region = 73 }

</bundles_post_ra>
